<compile_context>
chip_gen: v7x
topology: tpu7x:2x2x1
jax: 0.10.0
libtpu: 0.0.40
codegen_flags: <defaults>
</compile_context>

<pallas_src>
import math

import jax
import jax.numpy as jnp
from jax import lax
from jax.experimental import pallas as pl
from jax.experimental.pallas import tpu as pltpu


def _round_up(x, m):
    return (x + m - 1) // m * m


# ----------------------------------- kernel -----------------------------------
def embedding_kernel(ids_ref, table_ref, out_ref):
    """ids_ref: (TB, 1) int32; table_ref: (VT, D) f32 vocab tile; out_ref: (TB, D) f32."""
    vstep = pl.program_id(1)
    tb = ids_ref.shape[0]
    vt = table_ref.shape[0]

    @pl.when(vstep == 0)
    def _():
        out_ref[...] = jnp.zeros_like(out_ref)

    # ids relative to this vocab tile; out-of-tile ids give all-zero one-hot rows.
    local = ids_ref[...] - vstep * vt                              # (TB, 1) int32
    onehot = (lax.broadcasted_iota(jnp.int32, (tb, vt), 1) == local).astype(jnp.float32)
    out_ref[...] += jnp.dot(onehot, table_ref[...],
                            preferred_element_type=jnp.float32)


# ----------------------------------- wrapper -----------------------------------
def word_embedding_forward(word_ids, table, *, token_tile=256, vocab_tile=4096):
    """word_ids: int (...,) ids; table: (V, D) f32 embedding matrix. Returns (..., D) f32.

    dropout(p=drop_rate) is identity in eval mode, so it is not applied here.
    # TODO(synk): train-mode dropout would need pltpu.prng_seed + stateful_bernoulli.
    """
    ids_flat = word_ids.reshape(-1).astype(jnp.int32)
    n = ids_flat.shape[0]
    v, d = table.shape

    # vocab tiling: 128-lane aligned, padded rows are zero and never selected
    vp = _round_up(v, 128)
    vt = _round_up(min(vocab_tile, vp), 128)
    vp = _round_up(vp, vt)
    nv = vp // vt
    table_p = jnp.pad(table.astype(jnp.float32), ((0, vp - v), (0, 0)))

    # token tiling: sublane-aligned tile; padded ids are 0 (sliced off afterwards)
    tb = min(token_tile, _round_up(n, 8))
    np_ = _round_up(n, tb)
    nt = np_ // tb
    ids_p = jnp.pad(ids_flat, (0, np_ - n)).reshape(np_, 1)

    out = pl.pallas_call(
        embedding_kernel,
        out_shape=jax.ShapeDtypeStruct((np_, d), jnp.float32),
        grid=(nt, nv),                                     # vocab (reduction) axis last
        in_specs=[
            pl.BlockSpec((tb, 1), lambda i, j: (i, 0)),    # token-id tile (double-buffered)
            pl.BlockSpec((vt, d), lambda i, j: (j, 0)),    # streamed vocab tile
        ],
        out_specs=pl.BlockSpec((tb, d), lambda i, j: (i, 0)),   # VMEM-resident accumulator
        compiler_params=pltpu.CompilerParams(
            dimension_semantics=("parallel", "arbitrary")),     # both TCs on v7x
        cost_estimate=pl.CostEstimate(
            flops=2 * np_ * vp * d,
            transcendentals=0,
            bytes_accessed=np_ * 4 + nt * vp * d * 4 + np_ * d * 4),
    )(ids_p, table_p)

    return out[:n].reshape(*word_ids.shape, d)


# ------------------------------ table construction ------------------------------
def build_embedding_table(key, num_words, word_dim):
    """nn.Embedding(num_words, word_dim, padding_idx=0): N(0,1) init, row 0 zeroed."""
    w = jax.random.normal(key, (num_words, word_dim), jnp.float32)
    return w.at[0].set(0.0)


def build_pretrained_table(key, glove_vectors, word_dim):
    """Pretrained path: concat([pad_vec (zeros), unk_vec (xavier_uniform), glove_vec])."""
    pad_vec = jnp.zeros((1, word_dim), jnp.float32)
    bound = math.sqrt(6.0 / (1 + word_dim))
    unk_vec = jax.random.uniform(key, (1, word_dim), jnp.float32, -bound, bound)
    return jnp.concatenate([pad_vec, unk_vec, glove_vectors.astype(jnp.float32)], axis=0)


# ------------------------------------- main -------------------------------------
if __name__ == "__main__":
    num_words, word_dim, batch, seq_len = 200, 128, 2, 12
    drop_rate = 0.1   # dropout is identity in eval mode

    key = jax.random.PRNGKey(0)
    k_ids, k_emb, k_unk, k_glove = jax.random.split(key, 4)

    word_ids = jax.random.randint(k_ids, (batch, seq_len), 0, num_words, dtype=jnp.int32)

    # ---- path 1: nn.Embedding(num_words, word_dim, padding_idx=0) ----
    table = build_embedding_table(k_emb, num_words, word_dim)
    out = jax.block_until_ready(word_embedding_forward(word_ids, table))
    ref = jnp.take(table, word_ids, axis=0)
    assert out.shape == (batch, seq_len, word_dim), out.shape
    if not jnp.allclose(out, ref, atol=1e-6):
        raise AssertionError(f"embedding path mismatch, max abs err = {jnp.max(jnp.abs(out - ref))}")

    # ---- path 2: pretrained (pad_vec + unk_vec + glove_vec) ----
    glove = jax.random.normal(k_glove, (num_words - 2, word_dim), jnp.float32)
    table2 = build_pretrained_table(k_unk, glove, word_dim)
    ids2 = jax.random.randint(k_ids, (batch, seq_len), 0, table2.shape[0], dtype=jnp.int32)
    out2 = jax.block_until_ready(word_embedding_forward(ids2, table2))
    ref2 = jnp.take(table2, ids2, axis=0)
    if not jnp.allclose(out2, ref2, atol=1e-6):
        raise AssertionError(f"pretrained path mismatch, max abs err = {jnp.max(jnp.abs(out2 - ref2))}")

    # ---- path 3: exercise the multi-vocab-tile (streamed table) accumulation path ----
    out3 = jax.block_until_ready(
        word_embedding_forward(word_ids, table, vocab_tile=128))
    if not jnp.allclose(out3, ref, atol=1e-6):
        raise AssertionError(f"vocab-tiled path mismatch, max abs err = {jnp.max(jnp.abs(out3 - ref))}")

    print("KERNEL_OK")
</pallas_src>

<mosaic_0001>
module attributes {stable_mosaic.version = 11 : i64} {
  func.func @embedding_kernel(%arg0: i32, %arg1: i32, %arg2: memref<24x1xi32, #tpu.memory_space<vmem>>, %arg3: memref<256x128xf32, #tpu.memory_space<vmem>>, %arg4: memref<24x128xf32, #tpu.memory_space<vmem>>) attributes {dimension_semantics = [#tpu.dimension_semantics<parallel>, #tpu.dimension_semantics<arbitrary>], iteration_bounds = array<i64: 1, 1>, scalar_prefetch = 0 : i64, scratch_operands = 0 : i64, tpu.core_type = #tpu.core_type<tc>, window_params = [{transform_indices = @transform_0, window_bounds = array<i64: 24, 1>}, {transform_indices = @transform_1, window_bounds = array<i64: 256, 128>}, {transform_indices = @transform_2, window_bounds = array<i64: 24, 128>}]} {
    %c0_i32 = arith.constant 0 : i32
    %0 = arith.cmpi eq, %arg1, %c0_i32 : i32
    %1 = arith.extui %0 : i1 to i32
    %c0_i32_0 = arith.constant 0 : i32
    %2 = arith.cmpi ne, %1, %c0_i32_0 : i32
    scf.if %2 {
      %cst_8 = arith.constant 0.000000e+00 : f32
      %17 = vector.broadcast %cst_8 : f32 to vector<24x128xf32>
      %c0_9 = arith.constant 0 : index
      %c0_10 = arith.constant 0 : index
      %18 = vector.load %arg4[%c0_9, %c0_10] : memref<24x128xf32, #tpu.memory_space<vmem>>, vector<24x128xf32>
      tpu.vector_store %arg4[%c0_9, %c0_10], %17 {strides = array<i32>} : memref<24x128xf32, #tpu.memory_space<vmem>>, vector<24x128xf32>,
    } else {
    }
    %c0 = arith.constant 0 : index
    %c0_1 = arith.constant 0 : index
    %3 = vector.load %arg2[%c0, %c0_1] : memref<24x1xi32, #tpu.memory_space<vmem>>, vector<24x1xi32>
    %c256_i32 = arith.constant 256 : i32
    %4 = arith.muli %arg1, %c256_i32 : i32
    %5 = vector.broadcast %4 : i32 to vector<24x1xi32>
    %6 = arith.subi %3, %5 : vector<24x1xi32>
    %7 = tpu.iota {dimensions = array<i32: 1>} : vector<24x256xi32>
    %8 = vector.broadcast %6 : vector<24x1xi32> to vector<24x256xi32>
    %9 = arith.cmpi eq, %7, %8 : vector<24x256xi32>
    %10 = arith.extui %9 : vector<24x256xi1> to vector<24x256xi32>
    %11 = arith.sitofp %10 : vector<24x256xi32> to vector<24x256xf32>
    %c0_2 = arith.constant 0 : index
    %c0_3 = arith.constant 0 : index
    %12 = vector.load %arg4[%c0_2, %c0_3] : memref<24x128xf32, #tpu.memory_space<vmem>>, vector<24x128xf32>
    %c0_4 = arith.constant 0 : index
    %c0_5 = arith.constant 0 : index
    %13 = vector.load %arg3[%c0_4, %c0_5] : memref<256x128xf32, #tpu.memory_space<vmem>>, vector<256x128xf32>
    %cst = arith.constant dense<0.000000e+00> : vector<24x128xf32>
    %14 = tpu.matmul %11, %13, %cst {dimension_numbers = #tpu.dot_dimension_numbers<[1], [0], [0], [1], [0, 0, 1, 1], [], []>} : vector<24x256xf32>, vector<256x128xf32>, vector<24x128xf32> -> vector<24x128xf32>
    %15 = arith.addf %12, %14 : vector<24x128xf32>
    %c0_6 = arith.constant 0 : index
    %c0_7 = arith.constant 0 : index
    %16 = vector.load %arg4[%c0_6, %c0_7] : memref<24x128xf32, #tpu.memory_space<vmem>>, vector<24x128xf32>
    tpu.vector_store %arg4[%c0_6, %c0_7], %15 {strides = array<i32>} : memref<24x128xf32, #tpu.memory_space<vmem>>, vector<24x128xf32>,
    return
  }
  func.func @transform_0(%arg0: i32, %arg1: i32) -> (i32, i32) {
    %c0_i32 = arith.constant 0 : i32
    %c0_i32_0 = arith.constant 0 : i32
    return %arg0, %c0_i32 : i32, i32
  }
  func.func @transform_1(%arg0: i32, %arg1: i32) -> (i32, i32) {
    %c0_i32 = arith.constant 0 : i32
    %c0_i32_0 = arith.constant 0 : i32
    return %arg1, %c0_i32 : i32, i32
  }
  func.func @transform_2(%arg0: i32, %arg1: i32) -> (i32, i32) {
    %c0_i32 = arith.constant 0 : i32
    %c0_i32_0 = arith.constant 0 : i32
    return %arg0, %c0_i32 : i32, i32
  }
}

</mosaic_0001>

<bundles_post_ra>
// kernel: tpu_custom_call.1
= control target key start
LH: loop header
LB: loop body
LE: loop exit
PB: predicated region body
PF: predicated region fallthrough
CT: control target
= control target key end

     0   :  { %7 = vsyncpa [#allocation3], 0  ;;  %s427_s0 = inlined_call_operand.vmem [shape: s32[24,1], index: 0, kind: input, shape index: {}]   ;;  %s428_s1 = inlined_call_operand.hbm [shape: f32[256,128], index: 1, kind: input, shape index: {}]   ;;  %s429_s2 = inlined_call_operand.hbm [shape: f32[24,128], index: 2, kind: output, shape index: {}]  }
   0x1   :  { %8 = vsyncpa [#allocation4], 0  ;;  %s367_s9 = smov [#allocation2]   ;;  %s319_s13 = scalar_lea.hbm %s428_s1, 4096 }
   0x2   :  { %s16_s10 = sshll.u32 %s367_s9, 4  ;;  %p320_p0 = scmp.ne.s32.totalorder %s428_s1, %s319_s13  ;;  %s17_s10 = int_to_ptr.vmem [resolvable:$true] %s16_s10 }
   0x3   :  { %p323_p1 = scmp.lt.u32.totalorder %s319_s13, %s428_s1 }
   0x5   :  { %p325_p2 = pnand %p323_p1, %p320_p0 }
   0x7   :  { %328 = shalt.err (!%p325_p2)
}
   0x8   :  { %s329_s18 = scalar_lea.vmem %s17_s10, 4096  ;;  %p334_p4 = scmp.lt.s32.totalorder %s17_s10, %s17_s10 }
   0x9   :  { %p330_p3 = scmp.ne.s32.totalorder %s17_s10, %s329_s18  ;;  %p335_p5 = scmp.lt.s32.totalorder %s329_s18, %s329_s18 }
   0xb   :  { %p336_p6 = por %p335_p5, %p334_p4 }
   0xd   :  { %p337_p7 = pnand %p336_p6, %p330_p3 }
   0xf   :  { %340 = shalt.err (!%p337_p7)
}
  0x10   :  { %s368_s19 = smov 128   ;;  %s369_s20 = smov 8  }
  0x11   :  { %22 = dma.hbm_to_vmem [thread:$0]  %s428_s1, 4096, %s17_s10, [#allocation3], %s368_s19, %s368_s19, %s369_s20  }
  0x12   :  { %363 = dma.done.wait [#allocation3], 4096  }
  0x13   :  { %364 = vsyncadd [#allocation3], 4294963200  ;;  %v370_v0 = vmov 0   ;;  %v34_v1 = vld [vmem:[%s427_s0 + $0x8] sm:$0xff]  ;;  %v35_v2 = vld [vmem:[%s427_s0 + $0x10] sm:$0xff]  ;;  %v41_v52 = vlaneseq  ;;  %v371_v57 = vmov 1.0  }
  0x14   :  { %317 = vset.pattern.permute.xlu0 %v370_v0  ;;  %318 = vset.pattern.permute.xlu1 %v370_v0  ;;  %v33_v3 = vld [vmem:[%s427_s0] sm:$0xff]  ;;  %v91_v5 = vld [vmem:[#allocation2 + $0x88] sm:$0xff]  ;;  %v92_v9 = vld [vmem:[#allocation2 + $0x90] sm:$0xff]  ;;  %s372_s0 = smov [#allocation5]  }
  0x15   :  { %48 = vperm.xlu0 %317, %v34_v1   ;;  %51 = vperm.xlu1 %318, %v35_v2   ;;  %v90_v4 = vld [vmem:[#allocation2 + $0x80] sm:$0xff]  ;;  %v75_v8 = vld [vmem:[#allocation2 + $0x8] sm:$0xff]  ;;  %v93_v10 = vld [vmem:[#allocation2 + $0x98] sm:$0xff]  ;;  %v42_v53 = vand.u32 127, %v41_v52  ;;  %s197_s1 = sshll.u32 %s372_s0, 4  ;;  %s198_s1 = int_to_ptr.vmem [resolvable:$true] %s197_s1 }
  0x16   :  { %v74_v6 = vld [vmem:[#allocation2] sm:$0xff]  ;;  %v262_v7 = vpack.c.bf16 %v91_v5, %v90_v4  ;;  %v266_v12 = vpack.c.bf16 %v93_v10, %v92_v9  ;;  %v76_v13 = vld [vmem:[#allocation2 + $0x10] sm:$0xff]  ;;  %v77_v14 = vld [vmem:[#allocation2 + $0x18] sm:$0xff]  ;;  %s341_s29 = scalar_lea.vmem %s198_s1, 384  ;;  %p346_p9 = scmp.lt.s32.totalorder %s198_s1, %s198_s1 }
  0x17   :  { %v264_v11 = vpack.c.bf16 %v75_v8, %v74_v6  ;;  %v94_v15 = vld [vmem:[#allocation2 + $0xa0] sm:$0xff]  ;;  %v95_v16 = vld [vmem:[#allocation2 + $0xa8] sm:$0xff]  ;;  %v268_v17 = vpack.c.bf16 %v77_v14, %v76_v13  ;;  %v96_v21 = vld [vmem:[#allocation2 + $0xb0] sm:$0xff]  ;;  %v43_v54 = vadd.s32 128, %v42_v53  ;;  %p342_p8 = scmp.ne.s32.totalorder %s198_s1, %s341_s29  ;;  %p347_p10 = scmp.lt.s32.totalorder %s341_s29, %s341_s29 }
  0x18   :  { %294 = vmatprep.subr.bf16.mxu1 %v262_v7  ;;  %263 = vmatprep.subr.bf16.mxu0 %v262_v7  ;;  %v270_v18 = vpack.c.bf16 %v95_v16, %v94_v15  ;;  %v78_v19 = vld [vmem:[#allocation2 + $0x20] sm:$0xff]  ;;  %v79_v20 = vld [vmem:[#allocation2 + $0x28] sm:$0xff]  ;;  %v97_v22 = vld [vmem:[#allocation2 + $0xb8] sm:$0xff] }
  0x19   :  { %45 = vperm.xlu0 %317, %v33_v3   ;;  %302 = vmatpush3.bf16.msra.mxu1 %v264_v11  ;;  %v272_v23 = vpack.c.bf16 %v79_v20, %v78_v19  ;;  %v274_v24 = vpack.c.bf16 %v97_v22, %v96_v21  ;;  %v80_v25 = vld [vmem:[#allocation2 + $0x30] sm:$0xff]  ;;  %v81_v26 = vld [vmem:[#allocation2 + $0x38] sm:$0xff]  ;;  %v98_v27 = vld [vmem:[#allocation2 + $0xc0] sm:$0xff]  ;;  %p348_p11 = por %p347_p10, %p346_p9 }
  0x1a   :  { %295 = vmatprep.subr.bf16.mxu1 %v266_v12  ;;  %265 = vmatpush3.bf16.msra.mxu0 %v264_v11  ;;  %v99_v28 = vld [vmem:[#allocation2 + $0xc8] sm:$0xff]  ;;  %v276_v29 = vpack.c.bf16 %v81_v26, %v80_v25  ;;  %v82_v31 = vld [vmem:[#allocation2 + $0x40] sm:$0xff]  ;;  %v100_v33 = vld [vmem:[#allocation2 + $0xd0] sm:$0xff] }
  0x1b   :  { %267 = vmatprep.subr.bf16.mxu0 %v266_v12  ;;  %v278_v30 = vpack.c.bf16 %v99_v28, %v98_v27  ;;  %v83_v32 = vld [vmem:[#allocation2 + $0x48] sm:$0xff]  ;;  %v101_v34 = vld [vmem:[#allocation2 + $0xd8] sm:$0xff]  ;;  %v84_v37 = vld [vmem:[#allocation2 + $0x50] sm:$0xff]  ;;  %p349_p12 = pnand %p348_p11, %p342_p8 }
  0x1c   :  { %v280_v35 = vpack.c.bf16 %v83_v32, %v82_v31  ;;  %v282_v36 = vpack.c.bf16 %v101_v34, %v100_v33  ;;  %v85_v38 = vld [vmem:[#allocation2 + $0x58] sm:$0xff]  ;;  %v102_v39 = vld [vmem:[#allocation2 + $0xe0] sm:$0xff]  ;;  %v103_v40 = vld [vmem:[#allocation2 + $0xe8] sm:$0xff] }
  0x1d   :  { %303 = vmatpush3.bf16.msra.mxu1 %v268_v17  ;;  %v284_v41 = vpack.c.bf16 %v85_v38, %v84_v37  ;;  %v286_v42 = vpack.c.bf16 %v103_v40, %v102_v39  ;;  %v86_v43 = vld [vmem:[#allocation2 + $0x60] sm:$0xff]  ;;  %v87_v44 = vld [vmem:[#allocation2 + $0x68] sm:$0xff]  ;;  %v104_v45 = vld [vmem:[#allocation2 + $0xf0] sm:$0xff] }
  0x1e   :  { %296 = vmatprep.subr.bf16.mxu1 %v270_v18  ;;  %269 = vmatpush3.bf16.msra.mxu0 %v268_v17  ;;  %v105_v46 = vld [vmem:[#allocation2 + $0xf8] sm:$0xff]  ;;  %v288_v47 = vpack.c.bf16 %v87_v44, %v86_v43  ;;  %v88_v49 = vld [vmem:[#allocation2 + $0x70] sm:$0xff] }
  0x1f   :  { %271 = vmatprep.subr.bf16.mxu0 %v270_v18  ;;  %v290_v48 = vpack.c.bf16 %v105_v46, %v104_v45  ;;  %v89_v50 = vld [vmem:[#allocation2 + $0x78] sm:$0xff] }
  0x20   :  { %v292_v51 = vpack.c.bf16 %v89_v50, %v88_v49 }
  0x21   :  { %304 = vmatpush3.bf16.msra.mxu1 %v272_v23 }
  0x22   :  { %297 = vmatprep.subr.bf16.mxu1 %v274_v24  ;;  %273 = vmatpush3.bf16.msra.mxu0 %v272_v23 }
  0x23   :  { %275 = vmatprep.subr.bf16.mxu0 %v274_v24 }
  0x25   :  { %305 = vmatpush3.bf16.msra.mxu1 %v276_v29 }
  0x26   :  { %298 = vmatprep.subr.bf16.mxu1 %v278_v30  ;;  %277 = vmatpush3.bf16.msra.mxu0 %v276_v29 }
  0x27   :  { %279 = vmatprep.subr.bf16.mxu0 %v278_v30 }
  0x29   :  { %306 = vmatpush3.bf16.msra.mxu1 %v280_v35 }
  0x2a   :  { %299 = vmatprep.subr.bf16.mxu1 %v282_v36  ;;  %281 = vmatpush3.bf16.msra.mxu0 %v280_v35 }
  0x2b   :  { %283 = vmatprep.subr.bf16.mxu0 %v282_v36 }
  0x2d   :  { %307 = vmatpush3.bf16.msra.mxu1 %v284_v41 }
  0x2e   :  { %300 = vmatprep.subr.bf16.mxu1 %v286_v42  ;;  %285 = vmatpush3.bf16.msra.mxu0 %v284_v41 }
  0x2f   :  { %287 = vmatprep.subr.bf16.mxu0 %v286_v42 }
  0x31   :  { %308 = vmatpush3.bf16.msra.mxu1 %v288_v47 }
  0x32   :  { %301 = vmatprep.subr.bf16.mxu1 %v290_v48  ;;  %289 = vmatpush3.bf16.msra.mxu0 %v288_v47 }
  0x33   :  { %291 = vmatprep.subr.bf16.mxu0 %v290_v48 }
  0x35   :  { %309 = vmatpush3.bf16.msra.mxu1 %v292_v51 }
  0x36   :  { %293 = vmatpush3.bf16.msra.mxu0 %v292_v51 }
  0x94   :  { %v49_v55 = vpop.permute.xlu0 %48  ;;  %v52_v56 = vpop.permute.xlu1 %51 }
  0x95   :  { %vm55_vm0 = vcmp.eq.s32.totalorder %v42_v53, %v49_v55  ;;  %vm56_vm1 = vcmp.eq.s32.totalorder %v43_v54, %v49_v55  ;;  %vm58_vm2 = vcmp.eq.s32.totalorder %v43_v54, %v52_v56  ;;  %vm57_vm3 = vcmp.eq.s32.totalorder %v42_v53, %v52_v56 }
  0x96   :  { %217 = vmatprep.mubr.msk.f32.mxu1 %vm56_vm1, %v371_v57 }
  0x97   :  { %218 = vmatmul.mubr.msk.f32.vlgmr.msra.gmra.mrb[0].mxu1 %vm55_vm0, %v371_v57 }
  0x98   :  { %v46_v58 = vpop.permute.xlu0 %45  ;;  %219 = vmatprep.mubr.msk.f32.mxu1 %vm58_vm2, %v371_v57 }
  0x99   :  { %vm53_vm4 = vcmp.eq.s32.totalorder %v42_v53, %v46_v58  ;;  %vm54_vm5 = vcmp.eq.s32.totalorder %v43_v54, %v46_v58 }
  0x9a   :  { %215 = vmatprep.mubr.msk.f32.mxu0 %vm54_vm5, %v371_v57 }
  0x9b   :  { %216 = vmatmul.mubr.msk.f32.vlgmr.msra.gmra.mrb[0].mxu0 %vm53_vm4, %v371_v57  ;;  %220 = vmatmul.mubr.msk.f32.gmra.mrb[2].mxu1 %vm57_vm3, %v371_v57 }
 0x16a   :  { %v256_v59 = vpop.f32.mrb[0].mxu1 }
 0x16b   :  { %v257_v60 = vpop.f32.mrb[1].mxu1 }
 0x16c   :  { %v258_v61 = vadd.f32 %v257_v60, %v256_v59 }
 0x16e   :  { %v253_v62 = vpop.f32.mrb[0].mxu0  ;;  %v259_v63 = vpop.f32.mrb[2].mxu1  ;;  %190 = vst [vmem:[#allocation5 + $0x8] sm:$0xff] %v258_v61 }
 0x16f   :  { %v254_v0 = vpop.f32.mrb[1].mxu0  ;;  %v260_v1 = vpop.f32.mrb[3].mxu1 }
 0x170   :  { %v255_v2 = vadd.f32 %v254_v0, %v253_v62  ;;  %v261_v3 = vadd.f32 %v260_v1, %v259_v63 }
 0x172   :  { %189 = vst [vmem:[#allocation5] sm:$0xff] %v255_v2  ;;  %191 = vst [vmem:[#allocation5 + $0x10] sm:$0xff] %v261_v3 }
 0x173   :  { %352 = shalt.err (!%p349_p12)
}
 0x174   :  { %s353_s4 = scalar_lea.hbm %s429_s2, 384 }
 0x175   :  { %p354_p13 = scmp.ne.s32.totalorder %s429_s2, %s353_s4  ;;  %p357_p0 = scmp.lt.u32.totalorder %s353_s4, %s429_s2 }
 0x177   :  { %p359_p1 = pnand %p357_p0, %p354_p13 }
 0x179   :  { %362 = shalt.err (!%p359_p1)
}
 0x17a   :  { %203 = dma.vmem_to_hbm [thread:$0]  %s198_s1, 384, %s429_s2, [#allocation4], %s368_s19, %s368_s19, %s369_s20  }
 0x17b   :  { %365 = dma.done.wait [#allocation4], 384  }
 0x17c   :  { %366 = vsyncadd [#allocation4], 4294966912 }
 0x17d   :  { %207 = vsyncpa [#allocation3], 1 }
 0x17e   :  { %208 = vsyncpa [#allocation4], 1 }

</bundles_post_ra>
